<compile_context>
chip_gen: v7x
topology: tpu7x:2x2x1
jax: 0.10.0
libtpu: 0.0.40
codegen_flags: <defaults>
</compile_context>

<pallas_src>
import jax
import jax.numpy as jnp
from jax import lax
from jax.experimental import pallas as pl
from jax.experimental.pallas import tpu as pltpu

_OUT_ROWS = 8  # sublane-padded row count for the transposed output block


def mlp_kernel(x_ref,
               w1_ref, t1_ref,
               w2_ref, t2_ref,
               w3_ref, t3_ref,
               w4_ref, t4_ref,
               o_ref):
    x = x_ref[...]  # (tile, D), f32

    # Layers 1-3: Linear with eval-mode BN + bias folded into (W', shift'), ReLU.
    h = jnp.dot(x, w1_ref[...], preferred_element_type=jnp.float32) + t1_ref[...]
    h = jnp.maximum(h, 0.0)

    h = jnp.dot(h, w2_ref[...], preferred_element_type=jnp.float32) + t2_ref[...]
    h = jnp.maximum(h, 0.0)

    h = jnp.dot(h, w3_ref[...], preferred_element_type=jnp.float32) + t3_ref[...]
    h = jnp.maximum(h, 0.0)

    # Output layer, transposed (rows-in-lanes): (8,32) x (tile,32)^T -> (8, tile).
    # Only row 0 carries the real logit; rows 1-7 are zero-weight padding.
    z = lax.dot_general(w4_ref[...], h, (((1,), (1,)), ((), ())),
                        preferred_element_type=jnp.float32)
    o_ref[...] = jax.nn.sigmoid(z + t4_ref[...]).astype(o_ref.dtype)


def _round_up(n, m):
    return ((n + m - 1) // m) * m


def _cdiv(a, b):
    return -(-a // b)


def _fold_linear_bn(w, b, bn, eps=1e-5):
    """Fold eval-mode BatchNorm1d and the Linear bias into (W', shift').

    y = BN(x @ W.T + b) = x @ (W.T * s) + (b * s + t),
    with s = gamma / sqrt(var + eps), t = beta - mean * s.
    """
    gamma, beta, mean, var = bn
    s = gamma / jnp.sqrt(var + eps)
    t = beta - mean * s
    w_folded = (w.T * s[None, :]).astype(jnp.float32)   # (in, out)
    shift = ((b * s + t)[None, :]).astype(jnp.float32)  # (1, out)
    return w_folded, shift


def _choose_tile(B, D, batch_tile):
    """Pick (tile, n_steps) so padded_B = tile * n_steps."""
    # Cap the tile so the double-buffered x block stays well inside scoped VMEM
    # on every generation (v7x: 64 MiB physical / 32 MiB default scoped).
    vmem_budget = 16 * 1024 * 1024
    cap = max(128, (vmem_budget // (2 * 4 * max(D, 1))) // 128 * 128)
    batch_tile = max(128, min(_round_up(batch_tile, 128), cap))

    if B <= 256:
        # Single grid step; minimal (multiple-of-8) tail padding.
        return _round_up(max(B, 8), 8), 1

    # Multi-step: at least 2 steps so both v7x TensorCores get work; balance the
    # steps so the last block is mostly full.  tile is a multiple of 128 so the
    # transposed output block stays lane-dense (unmasked vst).
    n_steps = max(2, _cdiv(B, batch_tile))
    tile = min(batch_tile, _round_up(_cdiv(B, n_steps), 128))
    n_steps = max(2, _cdiv(B, tile))
    return tile, n_steps


def neural_network_forward(x, params, *, batch_tile=1024):
    x = x.astype(jnp.float32)
    B, D = x.shape

    (w1, b1, bn1, w2, b2, bn2, w3, b3, bn3, w4, b4) = params

    # Fold BN + bias into the weights (layers 1-3); last layer keeps bias only.
    w1f, t1 = _fold_linear_bn(w1, b1, bn1)
    w2f, t2 = _fold_linear_bn(w2, b2, bn2)
    w3f, t3 = _fold_linear_bn(w3, b3, bn3)

    # Last layer, transposed + sublane-padded: rows of w4p are output features.
    w4p = jnp.zeros((_OUT_ROWS, w4.shape[1]), jnp.float32).at[0, :].set(
        w4[0].astype(jnp.float32))                                   # (8, 32)
    t4 = jnp.zeros((_OUT_ROWS, 1), jnp.float32).at[0, 0].set(
        b4[0].astype(jnp.float32))                                   # (8, 1)

    tile, n_steps = _choose_tile(B, D, batch_tile)
    padded_B = tile * n_steps
    if padded_B != B:
        x = jnp.pad(x, ((0, padded_B - B), (0, 0)))

    def replicated(arr):
        # Whole-array block with a constant index map: weights/shifts stay
        # resident in VMEM and are not re-fetched per grid step.
        return pl.BlockSpec(arr.shape, lambda i: (0, 0))

    in_specs = [
        pl.BlockSpec((tile, D), lambda i: (i, 0)),  # x
        replicated(w1f), replicated(t1),
        replicated(w2f), replicated(t2),
        replicated(w3f), replicated(t3),
        replicated(w4p), replicated(t4),
    ]
    # Rows-in-lanes output: (8, padded_B), grid steps tile the lane dimension.
    out_specs = pl.BlockSpec((_OUT_ROWS, tile), lambda i: (0, i))

    out = pl.pallas_call(
        mlp_kernel,
        out_shape=jax.ShapeDtypeStruct((_OUT_ROWS, padded_B), jnp.float32),
        grid_spec=pltpu.PrefetchScalarGridSpec(
            num_scalar_prefetch=0,
            grid=(n_steps,),
            in_specs=in_specs,
            out_specs=out_specs,
        ),
        compiler_params=pltpu.CompilerParams(
            dimension_semantics=("parallel",)),
    )(x, w1f, t1, w2f, t2, w3f, t3, w4p, t4)

    # Row 0, first B columns is the real sigmoid output (contiguous slice).
    return out[0, :B].reshape(B, 1)


def init_params(key, input_size):
    """nn.Linear-style init plus *non-trivial* BatchNorm running stats so the
    BN-folding path is actually exercised."""
    def linear(key, fan_in, fan_out):
        kw, kb = jax.random.split(key)
        bound = 1.0 / jnp.sqrt(float(fan_in))
        w = jax.random.uniform(kw, (fan_out, fan_in), jnp.float32, -bound, bound)
        b = jax.random.uniform(kb, (fan_out,), jnp.float32, -bound, bound)
        return w, b

    def bn(key, c):
        kg, kb, km, kv = jax.random.split(key, 4)
        gamma = jax.random.uniform(kg, (c,), jnp.float32, 0.5, 1.5)
        beta = 0.1 * jax.random.normal(kb, (c,), jnp.float32)
        running_mean = 0.1 * jax.random.normal(km, (c,), jnp.float32)
        running_var = jax.random.uniform(kv, (c,), jnp.float32, 0.5, 1.5)
        return gamma, beta, running_mean, running_var

    k1, k2, k3, k4, kb1, kb2, kb3 = jax.random.split(key, 7)
    w1, b1 = linear(k1, input_size, 128)
    w2, b2 = linear(k2, 128, 64)
    w3, b3 = linear(k3, 64, 32)
    w4, b4 = linear(k4, 32, 1)
    return (w1, b1, bn(kb1, 128), w2, b2, bn(kb2, 64), w3, b3, bn(kb3, 32), w4, b4)


def reference_forward(x, params):
    (w1, b1, bn1, w2, b2, bn2, w3, b3, bn3, w4, b4) = params

    def bn_apply(h, bn):
        g, be, m, v = bn
        return (h - m) / jnp.sqrt(v + 1e-5) * g + be

    h = jnp.maximum(bn_apply(x @ w1.T + b1, bn1), 0.0)
    h = jnp.maximum(bn_apply(h @ w2.T + b2, bn2), 0.0)
    h = jnp.maximum(bn_apply(h @ w3.T + b3, bn3), 0.0)
    return jax.nn.sigmoid(h @ w4.T + b4)


if __name__ == "__main__":
    key = jax.random.PRNGKey(0)
    k_params, k_x = jax.random.split(key)

    batch, input_size = 16, 32
    params = init_params(k_params, input_size)
    x = jax.random.normal(k_x, (batch, input_size), jnp.float32)

    out = neural_network_forward(x, params)
    out = jax.block_until_ready(out)

    ref = reference_forward(x, params)
    assert out.shape == (batch, 1)
    assert jnp.max(jnp.abs(out - ref)) < 1e-5, "mismatch vs pure-JAX reference"

    print("KERNEL_OK")
</pallas_src>

<mosaic_0001>
module attributes {stable_mosaic.version = 11 : i64} {
  func.func @mlp_kernel(%arg0: i32, %arg1: memref<16x32xf32, #tpu.memory_space<vmem>>, %arg2: memref<32x128xf32, #tpu.memory_space<vmem>>, %arg3: memref<1x128xf32, #tpu.memory_space<vmem>>, %arg4: memref<128x64xf32, #tpu.memory_space<vmem>>, %arg5: memref<1x64xf32, #tpu.memory_space<vmem>>, %arg6: memref<64x32xf32, #tpu.memory_space<vmem>>, %arg7: memref<1x32xf32, #tpu.memory_space<vmem>>, %arg8: memref<8x32xf32, #tpu.memory_space<vmem>>, %arg9: memref<8x1xf32, #tpu.memory_space<vmem>>, %arg10: memref<8x16xf32, #tpu.memory_space<vmem>>) attributes {dimension_semantics = [#tpu.dimension_semantics<parallel>], iteration_bounds = array<i64: 1>, scalar_prefetch = 0 : i64, scratch_operands = 0 : i64, tpu.core_type = #tpu.core_type<tc>, window_params = [{transform_indices = @transform_0, window_bounds = array<i64: 16, 32>}, {pipeline_mode = #tpu.pipeline_mode<synchronous>, transform_indices = @transform_1, window_bounds = array<i64: 32, 128>}, {pipeline_mode = #tpu.pipeline_mode<synchronous>, transform_indices = @transform_2, window_bounds = array<i64: 1, 128>}, {pipeline_mode = #tpu.pipeline_mode<synchronous>, transform_indices = @transform_3, window_bounds = array<i64: 128, 64>}, {pipeline_mode = #tpu.pipeline_mode<synchronous>, transform_indices = @transform_4, window_bounds = array<i64: 1, 64>}, {pipeline_mode = #tpu.pipeline_mode<synchronous>, transform_indices = @transform_5, window_bounds = array<i64: 64, 32>}, {pipeline_mode = #tpu.pipeline_mode<synchronous>, transform_indices = @transform_6, window_bounds = array<i64: 1, 32>}, {pipeline_mode = #tpu.pipeline_mode<synchronous>, transform_indices = @transform_7, window_bounds = array<i64: 8, 32>}, {pipeline_mode = #tpu.pipeline_mode<synchronous>, transform_indices = @transform_8, window_bounds = array<i64: 8, 1>}, {transform_indices = @transform_9, window_bounds = array<i64: 8, 16>}]} {
    %c0 = arith.constant 0 : index
    %c0_0 = arith.constant 0 : index
    %0 = vector.load %arg1[%c0, %c0_0] : memref<16x32xf32, #tpu.memory_space<vmem>>, vector<16x32xf32>
    %c0_1 = arith.constant 0 : index
    %c0_2 = arith.constant 0 : index
    %1 = vector.load %arg2[%c0_1, %c0_2] : memref<32x128xf32, #tpu.memory_space<vmem>>, vector<32x128xf32>
    %cst = arith.constant dense<0.000000e+00> : vector<16x128xf32>
    %2 = tpu.matmul %0, %1, %cst {dimension_numbers = #tpu.dot_dimension_numbers<[1], [0], [0], [1], [0, 0, 1, 1], [], []>} : vector<16x32xf32>, vector<32x128xf32>, vector<16x128xf32> -> vector<16x128xf32>
    %c0_3 = arith.constant 0 : index
    %c0_4 = arith.constant 0 : index
    %3 = vector.load %arg3[%c0_3, %c0_4] : memref<1x128xf32, #tpu.memory_space<vmem>>, vector<1x128xf32>
    %4 = vector.broadcast %3 : vector<1x128xf32> to vector<16x128xf32>
    %5 = arith.addf %2, %4 : vector<16x128xf32>
    %cst_5 = arith.constant 0.000000e+00 : f32
    %6 = vector.broadcast %cst_5 : f32 to vector<16x128xf32>
    %7 = arith.maximumf %5, %6 : vector<16x128xf32>
    %c0_6 = arith.constant 0 : index
    %c0_7 = arith.constant 0 : index
    %8 = vector.load %arg4[%c0_6, %c0_7] : memref<128x64xf32, #tpu.memory_space<vmem>>, vector<128x64xf32>
    %cst_8 = arith.constant dense<0.000000e+00> : vector<16x64xf32>
    %9 = tpu.matmul %7, %8, %cst_8 {dimension_numbers = #tpu.dot_dimension_numbers<[1], [0], [0], [1], [0, 0, 1, 1], [], []>} : vector<16x128xf32>, vector<128x64xf32>, vector<16x64xf32> -> vector<16x64xf32>
    %c0_9 = arith.constant 0 : index
    %c0_10 = arith.constant 0 : index
    %10 = vector.load %arg5[%c0_9, %c0_10] : memref<1x64xf32, #tpu.memory_space<vmem>>, vector<1x64xf32>
    %11 = vector.broadcast %10 : vector<1x64xf32> to vector<16x64xf32>
    %12 = arith.addf %9, %11 : vector<16x64xf32>
    %cst_11 = arith.constant 0.000000e+00 : f32
    %13 = vector.broadcast %cst_11 : f32 to vector<16x64xf32>
    %14 = arith.maximumf %12, %13 : vector<16x64xf32>
    %c0_12 = arith.constant 0 : index
    %c0_13 = arith.constant 0 : index
    %15 = vector.load %arg6[%c0_12, %c0_13] : memref<64x32xf32, #tpu.memory_space<vmem>>, vector<64x32xf32>
    %cst_14 = arith.constant dense<0.000000e+00> : vector<16x32xf32>
    %16 = tpu.matmul %14, %15, %cst_14 {dimension_numbers = #tpu.dot_dimension_numbers<[1], [0], [0], [1], [0, 0, 1, 1], [], []>} : vector<16x64xf32>, vector<64x32xf32>, vector<16x32xf32> -> vector<16x32xf32>
    %c0_15 = arith.constant 0 : index
    %c0_16 = arith.constant 0 : index
    %17 = vector.load %arg7[%c0_15, %c0_16] : memref<1x32xf32, #tpu.memory_space<vmem>>, vector<1x32xf32>
    %18 = vector.broadcast %17 : vector<1x32xf32> to vector<16x32xf32>
    %19 = arith.addf %16, %18 : vector<16x32xf32>
    %cst_17 = arith.constant 0.000000e+00 : f32
    %20 = vector.broadcast %cst_17 : f32 to vector<16x32xf32>
    %21 = arith.maximumf %19, %20 : vector<16x32xf32>
    %c0_18 = arith.constant 0 : index
    %c0_19 = arith.constant 0 : index
    %22 = vector.load %arg8[%c0_18, %c0_19] : memref<8x32xf32, #tpu.memory_space<vmem>>, vector<8x32xf32>
    %cst_20 = arith.constant dense<0.000000e+00> : vector<8x16xf32>
    %23 = tpu.matmul %22, %21, %cst_20 {dimension_numbers = #tpu.dot_dimension_numbers<[1], [1], [0], [0], [0, 0, 1, 0], [], []>} : vector<8x32xf32>, vector<16x32xf32>, vector<8x16xf32> -> vector<8x16xf32>
    %c0_21 = arith.constant 0 : index
    %c0_22 = arith.constant 0 : index
    %24 = vector.load %arg9[%c0_21, %c0_22] : memref<8x1xf32, #tpu.memory_space<vmem>>, vector<8x1xf32>
    %25 = vector.broadcast %24 : vector<8x1xf32> to vector<8x16xf32>
    %26 = arith.addf %23, %25 : vector<8x16xf32>
    %27 = arith.negf %26 : vector<8x16xf32>
    %28 = math.exp %27 : vector<8x16xf32>
    %cst_23 = arith.constant 1.000000e+00 : f32
    %29 = vector.broadcast %cst_23 : f32 to vector<8x16xf32>
    %30 = arith.addf %29, %28 : vector<8x16xf32>
    %31 = arith.divf %29, %30 : vector<8x16xf32>
    %c0_24 = arith.constant 0 : index
    %c0_25 = arith.constant 0 : index
    %32 = vector.load %arg10[%c0_24, %c0_25] : memref<8x16xf32, #tpu.memory_space<vmem>>, vector<8x16xf32>
    tpu.vector_store %arg10[%c0_24, %c0_25], %31 {strides = array<i32>} : memref<8x16xf32, #tpu.memory_space<vmem>>, vector<8x16xf32>,
    return
  }
  func.func @transform_0(%arg0: i32) -> (i32, i32) {
    %c0_i32 = arith.constant 0 : i32
    %c0_i32_0 = arith.constant 0 : i32
    return %arg0, %c0_i32 : i32, i32
  }
  func.func @transform_1(%arg0: i32) -> (i32, i32) {
    %c0_i32 = arith.constant 0 : i32
    %c0_i32_0 = arith.constant 0 : i32
    %c0_i32_1 = arith.constant 0 : i32
    return %c0_i32, %c0_i32_0 : i32, i32
  }
  func.func @transform_2(%arg0: i32) -> (i32, i32) {
    %c0_i32 = arith.constant 0 : i32
    %c0_i32_0 = arith.constant 0 : i32
    %c0_i32_1 = arith.constant 0 : i32
    return %c0_i32, %c0_i32_0 : i32, i32
  }
  func.func @transform_3(%arg0: i32) -> (i32, i32) {
    %c0_i32 = arith.constant 0 : i32
    %c0_i32_0 = arith.constant 0 : i32
    %c0_i32_1 = arith.constant 0 : i32
    return %c0_i32, %c0_i32_0 : i32, i32
  }
  func.func @transform_4(%arg0: i32) -> (i32, i32) {
    %c0_i32 = arith.constant 0 : i32
    %c0_i32_0 = arith.constant 0 : i32
    %c0_i32_1 = arith.constant 0 : i32
    return %c0_i32, %c0_i32_0 : i32, i32
  }
  func.func @transform_5(%arg0: i32) -> (i32, i32) {
    %c0_i32 = arith.constant 0 : i32
    %c0_i32_0 = arith.constant 0 : i32
    %c0_i32_1 = arith.constant 0 : i32
    return %c0_i32, %c0_i32_0 : i32, i32
  }
  func.func @transform_6(%arg0: i32) -> (i32, i32) {
    %c0_i32 = arith.constant 0 : i32
    %c0_i32_0 = arith.constant 0 : i32
    %c0_i32_1 = arith.constant 0 : i32
    return %c0_i32, %c0_i32_0 : i32, i32
  }
  func.func @transform_7(%arg0: i32) -> (i32, i32) {
    %c0_i32 = arith.constant 0 : i32
    %c0_i32_0 = arith.constant 0 : i32
    %c0_i32_1 = arith.constant 0 : i32
    return %c0_i32, %c0_i32_0 : i32, i32
  }
  func.func @transform_8(%arg0: i32) -> (i32, i32) {
    %c0_i32 = arith.constant 0 : i32
    %c0_i32_0 = arith.constant 0 : i32
    %c0_i32_1 = arith.constant 0 : i32
    return %c0_i32, %c0_i32_0 : i32, i32
  }
  func.func @transform_9(%arg0: i32) -> (i32, i32) {
    %c0_i32 = arith.constant 0 : i32
    %c0_i32_0 = arith.constant 0 : i32
    return %c0_i32, %arg0 : i32, i32
  }
}

</mosaic_0001>

<bundles_post_ra>
// kernel: tpu_custom_call.1
= control target key start
LH: loop header
LB: loop body
LE: loop exit
PB: predicated region body
PF: predicated region fallthrough
CT: control target
= control target key end

     0   :  { %vm46_vm0 = vcmask 261120   ;;  %s828_s0 = inlined_call_operand.vmem [shape: f32[16,32], index: 0, kind: input, shape index: {}]   ;;  %s829_s1 = inlined_call_operand.vmem [shape: f32[32,128], index: 1, kind: input, shape index: {}]   ;;  %s830_s2 = inlined_call_operand.vmem [shape: f32[1,128], index: 2, kind: input, shape index: {}]   ;;  %s831_s3 = inlined_call_operand.vmem [shape: f32[128,64], index: 3, kind: input, shape index: {}]   ;;  %s832_s4 = inlined_call_operand.vmem [shape: f32[1,64], index: 4, kind: input, shape index: {}]   ;;  %s833_s5 = inlined_call_operand.vmem [shape: f32[64,32], index: 5, kind: input, shape index: {}]   ;;  %s834_s6 = inlined_call_operand.vmem [shape: f32[1,32], index: 6, kind: input, shape index: {}]   ;;  %s835_s7 = inlined_call_operand.vmem [shape: f32[8,32], index: 7, kind: input, shape index: {}]   ;;  %s836_s8 = inlined_call_operand.vmem [shape: f32[8,1], index: 8, kind: input, shape index: {}]   ;;  %s837_s9 = inlined_call_operand.hbm [shape: f32[8,16], index: 9, kind: output, shape index: {}]  }
   0x1   :  { %v35_v0 = vld [vmem:[%s829_s1] sm:$0xff]  ;;  %v36_v1 = vld [vmem:[%s829_s1 + $0x8] sm:$0xff]  ;;  %v37_v2 = vld [vmem:[%s829_s1 + $0x10] sm:$0xff] }
   0x2   :  { %v557_v3 = vpack.c.bf16 %v36_v1, %v35_v0  ;;  %v38_v4 = vld [vmem:[%s829_s1 + $0x18] sm:$0xff]  ;;  %v33_v5 = vld [vmem:[%s828_s0] sm:$0xff]  ;;  %v131_v8 = vld [vmem:[%s831_s3 + $0x8] sm:$0xff] }
   0x3   :  { %v561_v6 = vpack.c.bf16 %v38_v4, %v37_v2  ;;  %493 = vmatprep.mubr.msk.f32.mxu0 %vm46_vm0, %v33_v5  ;;  %v130_v7 = vld [vmem:[%s831_s3] sm:$0xff]  ;;  %v132_v9 = vld [vmem:[%s831_s3 + $0x10] sm:$0xff]  ;;  %v133_v11 = vld [vmem:[%s831_s3 + $0x18] sm:$0xff] }
   0x4   :  { %558 = vmatprep.subr.bf16.mxu0 %v557_v3  ;;  %v565_v10 = vpack.c.bf16 %v131_v8, %v130_v7  ;;  %v569_v12 = vpack.c.bf16 %v133_v11, %v132_v9  ;;  %v134_v13 = vld [vmem:[%s831_s3 + $0x20] sm:$0xff]  ;;  %v135_v14 = vld [vmem:[%s831_s3 + $0x28] sm:$0xff] }
   0x5   :  { %560 = vmatpush3.bf16.msra.mxu0 %v557_v3 }
   0x6   :  { %562 = vmatprep.subr.bf16.mxu0 %v561_v6  ;;  %566 = vmatprep.subr.bf16.mxu1 %v565_v10 }
   0x7   :  { %568 = vmatpush3.bf16.msra.mxu1 %v565_v10 }
   0x8   :  { %14 = vsyncpa [#allocation3], 0  ;;  %570 = vmatprep.subr.bf16.mxu1 %v569_v12  ;;  %v573_v15 = vpack.c.bf16 %v135_v14, %v134_v13  ;;  %v34_v16 = vld [vmem:[%s828_s0 + $0x8] sm:$0xff]  ;;  %v136_v17 = vld [vmem:[%s831_s3 + $0x30] sm:$0xff]  ;;  %vm245_vm1 = vcmask 523264   ;;  %v651_v58 = vmov 0.0|0.0  }
   0x9   :  { %564 = vmatpush3.bf16.msra.mxu0 %v561_v6  ;;  %v137_v18 = vld [vmem:[%s831_s3 + $0x38] sm:$0xff]  ;;  %v138_v20 = vld [vmem:[%s831_s3 + $0x40] sm:$0xff]  ;;  %v139_v21 = vld [vmem:[%s831_s3 + $0x48] sm:$0xff]  ;;  %vm652_vm2 = vmmov 0   ;;  %v653_v59 = vmov 0.0   ;;  %v654_v61 = vmov 0  }
   0xa   :  { %v577_v19 = vpack.c.bf16 %v137_v18, %v136_v17  ;;  %v581_v22 = vpack.c.bf16 %v139_v21, %v138_v20  ;;  %v140_v23 = vld [vmem:[%s831_s3 + $0x50] sm:$0xff]  ;;  %v141_v24 = vld [vmem:[%s831_s3 + $0x58] sm:$0xff]  ;;  %v142_v26 = vld [vmem:[%s831_s3 + $0x60] sm:$0xff]  ;;  %622 = vset.pattern.permute.xlu0 %v654_v61  ;;  %vm421_vm4 = vcmask 130048  }
   0xb   :  { %572 = vmatpush3.bf16.msra.mxu1 %v569_v12  ;;  %v585_v25 = vpack.c.bf16 %v141_v24, %v140_v23  ;;  %v143_v27 = vld [vmem:[%s831_s3 + $0x68] sm:$0xff]  ;;  %v144_v29 = vld [vmem:[%s831_s3 + $0x70] sm:$0xff]  ;;  %v145_v30 = vld [vmem:[%s831_s3 + $0x78] sm:$0xff] }
   0xc   :  { %494 = vmatmul.mubr.msk.f32.vlgmr.msra.gmra.mrb[0].mxu0 %vm46_vm0, %v34_v16  ;;  %574 = vmatprep.subr.bf16.mxu1 %v573_v15  ;;  %v589_v28 = vpack.c.bf16 %v143_v27, %v142_v26  ;;  %v593_v31 = vpack.c.bf16 %v145_v30, %v144_v29  ;;  %v230_v32 = vld [vmem:[%s833_s5] sm:$0xff]  ;;  %v231_v33 = vld [vmem:[%s833_s5 + $0x8] sm:$0xff]  ;;  %v232_v34 = vld [vmem:[%s833_s5 + $0x10] sm:$0xff] }
   0xd   :  { %v597_v35 = vpack.c.bf16 %v231_v33, %v230_v32  ;;  %v233_v36 = vld [vmem:[%s833_s5 + $0x18] sm:$0xff]  ;;  %v234_v38 = vld [vmem:[%s833_s5 + $0x20] sm:$0xff]  ;;  %v235_v39 = vld [vmem:[%s833_s5 + $0x28] sm:$0xff] }
   0xe   :  { %v601_v37 = vpack.c.bf16 %v233_v36, %v232_v34  ;;  %v605_v40 = vpack.c.bf16 %v235_v39, %v234_v38  ;;  %v437_v41 = vld [vmem:[%s830_s2] ss:$0 sm:$0xff]  ;;  %v236_v48 = vld [vmem:[%s833_s5 + $0x30] sm:$0xff]  ;;  %v237_v49 = vld [vmem:[%s833_s5 + $0x38] sm:$0xff] }
   0xf   :  { %576 = vmatpush3.bf16.msra.mxu1 %v573_v15  ;;  %598 = vmatprep.subr.bf16.mxu0 %v597_v35  ;;  %v609_v50 = vpack.c.bf16 %v237_v49, %v236_v48  ;;  %v440_v51 = vld [vmem:[%s832_s4] ss:$0 sm:$0xff]  ;;  %vm615_vm3 = vmpackc.low %vm46_vm0, %vm46_vm0 }
  0x10   :  { %578 = vmatprep.subr.bf16.mxu1 %v577_v19  ;;  %600 = vmatpush3.bf16.msra.mxu0 %v597_v35  ;;  %v330_v60 = vld [vmem:[%s836_s8] sm:$0xff] }
  0x11   :  { %602 = vmatprep.subr.bf16.mxu0 %v601_v37  ;;  %333 = vperm.xlu0 %622, %v330_v60   ;;  %v441_v62 = vld [vmem:[%s834_s6] ss:$0 sm:$0xff]  ;;  %s655_s6 = smov [#allocation2]  }
  0x12   :  { %v329_v6 = vld [vmem:[%s835_s7] sm:$0xff]  ;;  %s429_s27 = sshll.u32 %s655_s6, 4  ;;  %s430_s27 = int_to_ptr.vmem [resolvable:$true] %s429_s27 }
  0x13   :  { %580 = vmatpush3.bf16.msra.mxu1 %v577_v19  ;;  %s627_s28 = scalar_lea.vmem %s430_s27, 128  ;;  %p632_p1 = scmp.lt.s32.totalorder %s430_s27, %s430_s27 }
  0x14   :  { %582 = vmatprep.subr.bf16.mxu1 %v581_v22  ;;  %604 = vmatpush3.bf16.msra.mxu0 %v601_v37  ;;  %p628_p0 = scmp.ne.s32.totalorder %s430_s27, %s627_s28  ;;  %p633_p2 = scmp.lt.s32.totalorder %s627_s28, %s627_s28 }
  0x15   :  { %606 = vmatprep.subr.bf16.mxu0 %v605_v40 }
  0x16   :  { %p634_p3 = por %p633_p2, %p632_p1 }
  0x17   :  { %584 = vmatpush3.bf16.msra.mxu1 %v581_v22 }
  0x18   :  { %586 = vmatprep.subr.bf16.mxu1 %v585_v25  ;;  %608 = vmatpush3.bf16.msra.mxu0 %v605_v40  ;;  %p635_p4 = pnand %p634_p3, %p628_p0 }
  0x19   :  { %610 = vmatprep.subr.bf16.mxu0 %v609_v50 }
  0x1b   :  { %588 = vmatpush3.bf16.msra.mxu1 %v585_v25 }
  0x1c   :  { %590 = vmatprep.subr.bf16.mxu1 %v589_v28  ;;  %612 = vmatpush3.bf16.msra.mxu0 %v609_v50 }
  0x1d   :  { %613 = vmatprep.subr.bf16.mxu0 %v651_v58 }
  0x1f   :  { %592 = vmatpush3.bf16.msra.mxu1 %v589_v28 }
  0x20   :  { %594 = vmatprep.subr.bf16.mxu1 %v593_v31 }
  0x23   :  { %596 = vmatpush3.bf16.msra.mxu1 %v593_v31 }
  0x90   :  { %v334_v7 = vpop.permute.xlu0 %333 }
  0xdf   :  { %v495_v42 = vpop.f32.mrb[0].mxu0 }
  0xe0   :  { %v125_v43 = vadd.f32 %v495_v42, %v437_v41  ;;  %v119_v44 = vpop.f32.mrb[1].mxu0 }
  0xe1   :  { %v120_v45 = vadd.f32 %v437_v41, %v119_v44 }
  0xe2   :  { %v129_v47 = vmax.f32 %v125_v43, 0.0 }
  0xe3   :  { %v128_v46 = vmax.f32 %v120_v45, 0.0 }
  0xe5   :  { %528 = vmatprep.mubr.f32.mxu1 %v128_v46 }
  0xe6   :  { %529 = vmatmul.mubr.f32.vlgmr.msra.gmra.mrb[0].mxu1 %v129_v47 }
 0x1b9   :  { %v530_v52 = vpop.f32.mrb[0].mxu1 }
 0x1ba   :  { %v225_v53 = vadd.f32 %v530_v52, %v440_v51  ;;  %v219_v54 = vpop.f32.mrb[1].mxu1 }
 0x1bb   :  { %v220_v55 = vadd.f32 %v440_v51, %v219_v54 }
 0x1bc   :  { %v229_v57 = vmax.f32 %v225_v53, 0.0 }
 0x1bd   :  { %v228_v56 = vmax.f32 %v220_v55, 0.0 }
 0x1bf   :  { %547 = vmatprep.mubr.msk.f32.mxu0 %vm245_vm1, %v228_v56 }
 0x1c0   :  { %548 = vmatmul.mubr.msk.f32.vlgmr.msra.gmra.mrb[2].mxu0 %vm245_vm1, %v229_v57 }
 0x1c1   :  { %554 = vmatprep.mubr.msk.f32.mxu0 %vm652_vm2, %v653_v59 }
 0x293   :  { %v549_v63 = vpop.f32.mrb[2].mxu0 }
 0x294   :  { %v324_v0 = vadd.f32 %v549_v63, %v441_v62  ;;  %v318_v1 = vpop.f32.mrb[3].mxu0 }
 0x295   :  { %v319_v2 = vadd.f32 %v441_v62, %v318_v1 }
 0x296   :  { %v328_v3 = vmax.f32 %v324_v0, 0.0 }
 0x297   :  { %v327_v4 = vmax.f32 %v319_v2, 0.0 }
 0x299   :  { %v614_v5 = vpack.c.bf16 %v328_v3, %v327_v4 }
 0x29b   :  { %616 = vmatpush3.bf16.xpose.msk.msra.mxu0 %vm615_vm3, %v614_v5 }
 0x2a2   :  { %555 = vmatmul.mubr.msk.f32.vlgmr.msra.gmra.mrb[4].mxu0 %vm46_vm0, %v329_v6 }
 0x375   :  { %v411_v8 = vpop.f32.mrb[4].mxu0 }
 0x376   :  { %v412_v9 = vadd.f32 %v411_v8, %v334_v7  ;;  %v556_v10 = vpop.f32.mrb[5].mxu0 }
 0x378   :  { %v447_v11 = vmul.f32 -1.442695, %v412_v9 }
 0x37a   :  { %623 = vpow2.f32 %v447_v11 }
 0x384   :  { %v624_v12 = vpop.eup %623 }
 0x385   :  { %v418_v13 = vadd.f32 1.0, %v624_v12 }
 0x387   :  { %625 = vrcp.f32 %v418_v13 }
 0x391   :  { %v626_v14 = vpop.eup %625 }
 0x392   :  { %422 = vst.msk [vmem:[#allocation2] sm:$0xff] %vm421_vm4, %v626_v14 }
 0x393   :  { %638 = shalt.err (!%p635_p4)
}
 0x394   :  { %s639_s30 = scalar_lea.hbm %s837_s9, 128 }
 0x395   :  { %p640_p5 = scmp.ne.s32.totalorder %s837_s9, %s639_s30  ;;  %p643_p6 = scmp.lt.u32.totalorder %s639_s30, %s837_s9 }
 0x397   :  { %p645_p7 = pnand %p643_p6, %p640_p5 }
 0x399   :  { %648 = shalt.err (!%p645_p7)
}
 0x39a   :  { %432 = dma.vmem_to_hbm [thread:$0]  %s430_s27, 128, %s837_s9, [#allocation3]  }
 0x39b   :  { %649 = dma.done.wait [#allocation3], 128  }
 0x39c   :  { %650 = vsyncadd [#allocation3], 4294967168 }
 0x39d   :  { %436 = vsyncpa [#allocation3], 1 }

</bundles_post_ra>
